<compile_context>
chip_gen: v7x
topology: tpu7x:2x2x1
jax: 0.10.0
libtpu: 0.0.40
codegen_flags: <defaults>
</compile_context>

<pallas_src>
import jax
import jax.numpy as jnp
from jax.experimental import pallas as pl
from jax.experimental.pallas import tpu as pltpu


def _dfl_kernel(pred_ref, label_ref, loss_ref):
    """Per-sample Distribution Focal Loss.

    pred_ref : (TN, C) logits, native dtype (cast to f32 per tile in VMEM)
    label_ref: (TN, 1) target distances in [0, C-1]
    loss_ref : (TN, 1) per-sample loss, f32
    """
    z = pred_ref[...].astype(jnp.float32)             # (TN, C)
    lab = label_ref[...].astype(jnp.float32)          # (TN, 1)

    # Numerically stable log-sum-exp over the bin (lane) axis.
    m = jnp.max(z, axis=-1, keepdims=True)            # (TN, 1)
    e = jnp.exp(z - m)                                 # (TN, C)
    lse = m + jnp.log(jnp.sum(e, axis=-1, keepdims=True))   # (TN, 1)

    # Soft one-hot weights: w[c] = weight_left  at c == floor(label)
    #                       w[c] = weight_right at c == floor(label) + 1
    #                       w[c] = 0 elsewhere.
    # Because weight_left + weight_right == 1, the two cross-entropy terms of
    # the reference fuse into:  loss = lse - sum_c w[c] * pred[c].
    # NOTE: labels outside [0, C-1] would silently give w == 0 everywhere
    # (PyTorch's cross_entropy would raise instead) -- DFL inputs are clamped
    # upstream so this never triggers in practice.
    cols = jax.lax.broadcasted_iota(jnp.int32, z.shape, 1).astype(jnp.float32)
    w = jnp.maximum(1.0 - jnp.abs(cols - lab), 0.0)    # (TN, C)
    p = jnp.sum(w * z, axis=-1, keepdims=True)         # (TN, 1)

    loss_ref[...] = (lse - p).astype(loss_ref.dtype)


def _dfl_per_sample(pred, target, *, block_n=8192):
    """Run the Pallas kernel; returns per-sample loss with shape (N,) in f32."""
    n, c = pred.shape
    label = target.reshape(n, 1)          # free view; kernel casts per tile
    bn = min(block_n, n)                  # block first dim must not exceed array
    grid = (pl.cdiv(n, bn),)

    loss = pl.pallas_call(
        _dfl_kernel,
        out_shape=jax.ShapeDtypeStruct((n, 1), jnp.float32),
        grid_spec=pltpu.PrefetchScalarGridSpec(
            num_scalar_prefetch=0,
            grid=grid,
            in_specs=[
                pl.BlockSpec((bn, c), lambda i: (i, 0)),
                pl.BlockSpec((bn, 1), lambda i: (i, 0)),
            ],
            out_specs=pl.BlockSpec((bn, 1), lambda i: (i, 0)),
        ),
        compiler_params=pltpu.CompilerParams(
            dimension_semantics=("parallel",),
            # (bn, C) / (bn, 1) blocks are lane-padded to 128 in VMEM; 40 MiB
            # comfortably covers the double-buffered worst case (~25 MiB at
            # bn=8192, f32) on v5e/v6e/v7x.
            vmem_limit_bytes=40 * 1024 * 1024,
        ),
    )(pred, label)
    return loss[:, 0]


def _weight_reduce_loss(loss, weight=None, reduction="mean", avg_factor=None):
    """mmdet-style weight_reduce_loss (cheap glue, plain JAX)."""
    if weight is not None:
        loss = loss * weight
    if avg_factor is None:
        if reduction == "mean":
            return jnp.mean(loss)
        if reduction == "sum":
            return jnp.sum(loss)
        return loss
    else:
        if reduction == "mean":
            return jnp.sum(loss) / avg_factor
        elif reduction != "none":
            raise ValueError("avg_factor can not be used with reduction='sum'")
        return loss


class DistributionFocalLoss:
    """JAX/Pallas port of mmdet's DistributionFocalLoss (forward only)."""

    def __init__(self, reduction="mean", loss_weight=1.0, block_n=8192):
        self.reduction = reduction
        self.loss_weight = loss_weight
        self.block_n = block_n

    def __call__(self, pred, target, weight=None, avg_factor=None,
                 reduction_override=None):
        assert reduction_override in (None, "none", "mean", "sum")
        reduction = reduction_override if reduction_override else self.reduction
        loss = _dfl_per_sample(pred, target, block_n=self.block_n)
        loss = _weight_reduce_loss(loss, weight, reduction, avg_factor)
        return self.loss_weight * loss


def _reference_dfl(pred, label, weight=None, reduction="mean",
                   avg_factor=None, loss_weight=1.0):
    """Pure-JAX reference (mirrors the PyTorch formulation)."""
    pred = pred.astype(jnp.float32)
    label = label.astype(jnp.float32)
    logp = jax.nn.log_softmax(pred, axis=-1)
    dis_left = jnp.floor(label).astype(jnp.int32)
    dis_right = dis_left + 1
    wl = dis_right.astype(jnp.float32) - label
    wr = label - dis_left.astype(jnp.float32)
    ce_l = -jnp.take_along_axis(logp, dis_left[:, None], axis=-1)[:, 0]
    ce_r = -jnp.take_along_axis(logp, dis_right[:, None], axis=-1)[:, 0]
    loss = ce_l * wl + ce_r * wr
    loss = _weight_reduce_loss(loss, weight, reduction, avg_factor)
    return loss_weight * loss


if __name__ == "__main__":
    key = jax.random.PRNGKey(0)
    k1, k2, k3, k4, k5, k6, k7, k8 = jax.random.split(key, 8)

    # --- case 1: C = 16 (n = 15), N not a multiple of the block ---------------
    N, C = 200, 16
    pred = jax.random.normal(k1, (N, C), dtype=jnp.float32)
    target = jax.random.uniform(k2, (N,), dtype=jnp.float32,
                                minval=0.0, maxval=float(C - 1) - 1e-3)
    weight = jax.random.uniform(k3, (N,), dtype=jnp.float32)

    loss_fn = DistributionFocalLoss(reduction="mean", loss_weight=0.25)

    out = jax.block_until_ready(loss_fn(pred, target, weight=weight))
    ref = _reference_dfl(pred, target, weight=weight, reduction="mean",
                         loss_weight=0.25)
    assert jnp.allclose(out, ref, atol=1e-5, rtol=1e-5), (out, ref)

    out_none = jax.block_until_ready(
        loss_fn(pred, target, reduction_override="none"))
    ref_none = _reference_dfl(pred, target, reduction="none", loss_weight=0.25)
    assert jnp.allclose(out_none, ref_none, atol=1e-5, rtol=1e-5)

    # --- case 2: bf16 logits streamed natively (no wrapper pre-cast) ----------
    pred_bf16 = pred.astype(jnp.bfloat16)
    out_bf16 = jax.block_until_ready(
        loss_fn(pred_bf16, target, reduction_override="none"))
    ref_bf16 = _reference_dfl(pred_bf16.astype(jnp.float32), target,
                              reduction="none", loss_weight=0.25)
    assert jnp.allclose(out_bf16, ref_bf16, atol=1e-5, rtol=1e-5)

    # --- case 3: C = 17 (reg_max = 16, the usual GFL config), odd N -----------
    N2, C2 = 203, 17
    pred2 = jax.random.normal(k4, (N2, C2), dtype=jnp.float32)
    target2 = jax.random.uniform(k5, (N2,), dtype=jnp.float32,
                                 minval=0.0, maxval=float(C2 - 1) - 1e-3)
    weight2 = jax.random.uniform(k6, (N2,), dtype=jnp.float32)

    loss_fn2 = DistributionFocalLoss(reduction="mean", loss_weight=1.0)
    out_sum = jax.block_until_ready(
        loss_fn2(pred2, target2, reduction_override="sum"))
    ref_sum = _reference_dfl(pred2, target2, reduction="sum", loss_weight=1.0)
    assert jnp.allclose(out_sum, ref_sum, atol=1e-4, rtol=1e-5)

    out_avg = jax.block_until_ready(
        loss_fn2(pred2, target2, weight=weight2, avg_factor=37.5))
    ref_avg = _reference_dfl(pred2, target2, weight=weight2, reduction="mean",
                             avg_factor=37.5, loss_weight=1.0)
    assert jnp.allclose(out_avg, ref_avg, atol=1e-5, rtol=1e-5)

    # --- case 4: multi-block grid with a ragged tail (no host padding) --------
    N3, C3 = 1000, 16
    pred3 = jax.random.normal(k7, (N3, C3), dtype=jnp.float32)
    target3 = jax.random.uniform(k8, (N3,), dtype=jnp.float32,
                                 minval=0.0, maxval=float(C3 - 1) - 1e-3)
    per_sample = jax.block_until_ready(
        _dfl_per_sample(pred3, target3, block_n=128))   # grid=8, tail=104 rows
    ref3 = _reference_dfl(pred3, target3, reduction="none", loss_weight=1.0)
    assert jnp.allclose(per_sample, ref3, atol=1e-5, rtol=1e-5)

    print("KERNEL_OK")
</pallas_src>

<mosaic_0001>
module attributes {stable_mosaic.version = 11 : i64} {
  func.func @_dfl_kernel(%arg0: i32, %arg1: memref<200x16xf32, #tpu.memory_space<vmem>>, %arg2: memref<200x1xf32, #tpu.memory_space<vmem>>, %arg3: memref<200x1xf32, #tpu.memory_space<vmem>>) attributes {dimension_semantics = [#tpu.dimension_semantics<parallel>], iteration_bounds = array<i64: 1>, scalar_prefetch = 0 : i64, scratch_operands = 0 : i64, tpu.core_type = #tpu.core_type<tc>, window_params = [{transform_indices = @transform_0, window_bounds = array<i64: 200, 16>}, {transform_indices = @transform_1, window_bounds = array<i64: 200, 1>}, {transform_indices = @transform_2, window_bounds = array<i64: 200, 1>}]} {
    %c0 = arith.constant 0 : index
    %c0_0 = arith.constant 0 : index
    %0 = vector.load %arg1[%c0, %c0_0] : memref<200x16xf32, #tpu.memory_space<vmem>>, vector<200x16xf32>
    %c0_1 = arith.constant 0 : index
    %c0_2 = arith.constant 0 : index
    %1 = vector.load %arg2[%c0_1, %c0_2] : memref<200x1xf32, #tpu.memory_space<vmem>>, vector<200x1xf32>
    %cst = arith.constant dense<0xFF800000> : vector<200xf32>
    %2 = vector.multi_reduction <maximumf>, %0, %cst [1] : vector<200x16xf32> to vector<200xf32>
    %3 = vector.shape_cast %2 : vector<200xf32> to vector<200x1xf32>
    %4 = vector.broadcast %3 : vector<200x1xf32> to vector<200x16xf32>
    %5 = arith.subf %0, %4 : vector<200x16xf32>
    %6 = math.exp %5 : vector<200x16xf32>
    %cst_3 = arith.constant dense<0.000000e+00> : vector<200xf32>
    %7 = vector.multi_reduction <add>, %6, %cst_3 [1] : vector<200x16xf32> to vector<200xf32>
    %8 = vector.shape_cast %7 : vector<200xf32> to vector<200x1xf32>
    %9 = math.log %8 : vector<200x1xf32>
    %10 = arith.addf %3, %9 : vector<200x1xf32>
    %11 = tpu.iota {dimensions = array<i32: 1>} : vector<200x16xi32>
    %12 = arith.sitofp %11 : vector<200x16xi32> to vector<200x16xf32>
    %13 = vector.broadcast %1 : vector<200x1xf32> to vector<200x16xf32>
    %14 = arith.subf %12, %13 : vector<200x16xf32>
    %15 = math.absf %14 : vector<200x16xf32>
    %cst_4 = arith.constant 1.000000e+00 : f32
    %16 = vector.broadcast %cst_4 : f32 to vector<200x16xf32>
    %17 = arith.subf %16, %15 : vector<200x16xf32>
    %cst_5 = arith.constant 0.000000e+00 : f32
    %18 = vector.broadcast %cst_5 : f32 to vector<200x16xf32>
    %19 = arith.maximumf %17, %18 : vector<200x16xf32>
    %20 = arith.mulf %19, %0 : vector<200x16xf32>
    %cst_6 = arith.constant dense<0.000000e+00> : vector<200xf32>
    %21 = vector.multi_reduction <add>, %20, %cst_6 [1] : vector<200x16xf32> to vector<200xf32>
    %22 = vector.shape_cast %21 : vector<200xf32> to vector<200x1xf32>
    %23 = arith.subf %10, %22 : vector<200x1xf32>
    %c0_7 = arith.constant 0 : index
    %c0_8 = arith.constant 0 : index
    %24 = vector.load %arg3[%c0_7, %c0_8] : memref<200x1xf32, #tpu.memory_space<vmem>>, vector<200x1xf32>
    tpu.vector_store %arg3[%c0_7, %c0_8], %23 {strides = array<i32>} : memref<200x1xf32, #tpu.memory_space<vmem>>, vector<200x1xf32>,
    return
  }
  func.func @transform_0(%arg0: i32) -> (i32, i32) {
    %c0_i32 = arith.constant 0 : i32
    %c0_i32_0 = arith.constant 0 : i32
    return %arg0, %c0_i32 : i32, i32
  }
  func.func @transform_1(%arg0: i32) -> (i32, i32) {
    %c0_i32 = arith.constant 0 : i32
    %c0_i32_0 = arith.constant 0 : i32
    return %arg0, %c0_i32 : i32, i32
  }
  func.func @transform_2(%arg0: i32) -> (i32, i32) {
    %c0_i32 = arith.constant 0 : i32
    %c0_i32_0 = arith.constant 0 : i32
    return %arg0, %c0_i32 : i32, i32
  }
}

</mosaic_0001>

<bundles_post_ra>
// kernel: tpu_custom_call.1
= control target key start
LH: loop header
LB: loop body
LE: loop exit
PB: predicated region body
PF: predicated region fallthrough
CT: control target
= control target key end

     0   :  { %vm61_vm0 = vcmask 130048   ;;  %v848_v3 = vmov 0   ;;  %vm715_vm1 = vcmask 7168   ;;  %s1516_s0 = inlined_call_operand.vmem [shape: f32[200,16], index: 0, kind: input, shape index: {}]   ;;  %s1517_s1 = inlined_call_operand.vmem [shape: f32[200,1], index: 1, kind: input, shape index: {}]   ;;  %s1518_s2 = inlined_call_operand.vmem [shape: f32[200,1], index: 2, kind: output, shape index: {}]  }
   0x1   :  { %v867_v0 = vld [vmem:[%s1516_s0 + $0x10] sm:$0xff]  ;;  %v872_v1 = vld [vmem:[%s1516_s0] sm:$0xff]  ;;  %v877_v2 = vld [vmem:[%s1516_s0 + $0x18] sm:$0xff]  ;;  %747 = vset.pattern.permute.xlu1 %v848_v3  ;;  %746 = vset.pattern.permute.xlu0 %v848_v3 }
   0x2   :  { %v68_v4 = vsel %vm61_vm0, %v867_v0, -inf  ;;  %v62_v5 = vsel %vm61_vm0, %v872_v1, -inf  ;;  %v886_v6 = vld [vmem:[%s1516_s0 + $0x8] sm:$0xff]  ;;  %v71_v7 = vsel %vm61_vm0, %v877_v2, -inf  ;;  %v900_v10 = vld [vmem:[%s1516_s0 + $0x20] sm:$0xff]  ;;  %v909_v13 = vld [vmem:[%s1516_s0 + $0x38] sm:$0xff] }
   0x3   :  { %69 = vmax.xlane.f32.xlu1 %v68_v4  ;;  %63 = vmax.xlane.f32.xlu0 %v62_v5  ;;  %v65_v8 = vsel %vm61_vm0, %v886_v6, -inf  ;;  %v895_v9 = vld [vmem:[%s1516_s0 + $0x28] sm:$0xff]  ;;  %v74_v12 = vsel %vm61_vm0, %v900_v10, -inf  ;;  %v914_v14 = vld [vmem:[%s1516_s0 + $0x30] sm:$0xff]  ;;  %v83_v15 = vsel %vm61_vm0, %v909_v13, -inf  ;;  %v928_v18 = vld [vmem:[%s1516_s0 + $0x40] sm:$0xff] }
   0x4   :  { %v77_v11 = vsel %vm61_vm0, %v895_v9, -inf  ;;  %v80_v16 = vsel %vm61_vm0, %v914_v14, -inf  ;;  %v923_v17 = vld [vmem:[%s1516_s0 + $0x48] sm:$0xff]  ;;  %v86_v20 = vsel %vm61_vm0, %v928_v18, -inf  ;;  %v937_v21 = vld [vmem:[%s1516_s0 + $0x58] sm:$0xff]  ;;  %v942_v22 = vld [vmem:[%s1516_s0 + $0x50] sm:$0xff] }
   0x5   :  { %v89_v19 = vsel %vm61_vm0, %v923_v17, -inf  ;;  %v95_v23 = vsel %vm61_vm0, %v937_v21, -inf  ;;  %v92_v24 = vsel %vm61_vm0, %v942_v22, -inf  ;;  %v951_v25 = vld [vmem:[%s1516_s0 + $0x68] sm:$0xff]  ;;  %v956_v26 = vld [vmem:[%s1516_s0 + $0x60] sm:$0xff]  ;;  %v965_v29 = vld [vmem:[%s1516_s0 + $0x78] sm:$0xff] }
   0x6   :  { %v101_v27 = vsel %vm61_vm0, %v951_v25, -inf  ;;  %v98_v28 = vsel %vm61_vm0, %v956_v26, -inf  ;;  %v970_v30 = vld [vmem:[%s1516_s0 + $0x70] sm:$0xff]  ;;  %v107_v31 = vsel %vm61_vm0, %v965_v29, -inf  ;;  %v979_v33 = vld [vmem:[%s1516_s0 + $0x88] sm:$0xff]  ;;  %v984_v34 = vld [vmem:[%s1516_s0 + $0x80] sm:$0xff] }
   0x7   :  { %72 = vmax.xlane.f32.xlu1 %v71_v7  ;;  %66 = vmax.xlane.f32.xlu0 %v65_v8  ;;  %v104_v32 = vsel %vm61_vm0, %v970_v30, -inf  ;;  %v113_v35 = vsel %vm61_vm0, %v979_v33, -inf  ;;  %v110_v36 = vsel %vm61_vm0, %v984_v34, -inf  ;;  %v993_v37 = vld [vmem:[%s1516_s0 + $0x98] sm:$0xff]  ;;  %v998_v38 = vld [vmem:[%s1516_s0 + $0x90] sm:$0xff]  ;;  %v1007_v41 = vld [vmem:[%s1516_s0 + $0xa8] sm:$0xff] }
   0x8   :  { %v119_v39 = vsel %vm61_vm0, %v993_v37, -inf  ;;  %v116_v40 = vsel %vm61_vm0, %v998_v38, -inf  ;;  %v1012_v42 = vld [vmem:[%s1516_s0 + $0xa0] sm:$0xff]  ;;  %v125_v43 = vsel %vm61_vm0, %v1007_v41, -inf  ;;  %v1021_v45 = vld [vmem:[%s1516_s0 + $0xb8] sm:$0xff]  ;;  %v1026_v46 = vld [vmem:[%s1516_s0 + $0xb0] sm:$0xff] }
   0x9   :  { %v122_v44 = vsel %vm61_vm0, %v1012_v42, -inf  ;;  %v131_v47 = vsel %vm61_vm0, %v1021_v45, -inf  ;;  %v128_v48 = vsel %vm61_vm0, %v1026_v46, -inf  ;;  %v1035_v49 = vld [vmem:[%s1516_s0 + $0xc0] sm:$0xff]  ;;  %v37_v51 = vld [vmem:[%s1517_s1 + $0x8] sm:$0xff]  ;;  %v38_v52 = vld [vmem:[%s1517_s1 + $0x10] sm:$0xff] }
   0xa   :  { %v134_v50 = vsel %vm61_vm0, %v1035_v49, -inf  ;;  %v39_v53 = vld [vmem:[%s1517_s1 + $0x18] sm:$0xff]  ;;  %v36_v54 = vld [vmem:[%s1517_s1] sm:$0xff]  ;;  %v45_v56 = vld [vmem:[%s1517_s1 + $0x48] sm:$0xff] }
   0xb   :  { %78 = vmax.xlane.f32.xlu1 %v77_v11  ;;  %75 = vmax.xlane.f32.xlu0 %v74_v12  ;;  %v40_v55 = vld [vmem:[%s1517_s1 + $0x20] sm:$0xff]  ;;  %v41_v57 = vld [vmem:[%s1517_s1 + $0x28] sm:$0xff]  ;;  %v47_v58 = vld [vmem:[%s1517_s1 + $0x58] sm:$0xff] }
   0xc   :  { %v42_v59 = vld [vmem:[%s1517_s1 + $0x30] sm:$0xff]  ;;  %v49_v60 = vld [vmem:[%s1517_s1 + $0x68] sm:$0xff]  ;;  %v43_v61 = vld [vmem:[%s1517_s1 + $0x38] sm:$0xff] }
   0xd   :  { %v51_v62 = vld [vmem:[%s1517_s1 + $0x78] sm:$0xff]  ;;  %v44_v63 = vld [vmem:[%s1517_s1 + $0x40] sm:$0xff]  ;;  %v53_v3 = vld [vmem:[%s1517_s1 + $0x88] sm:$0xff] }
   0xe   :  { %v46_v4 = vld [vmem:[%s1517_s1 + $0x50] sm:$0xff]  ;;  %v48_v5 = vld [vmem:[%s1517_s1 + $0x60] sm:$0xff] }
   0xf   :  { %84 = vmax.xlane.f32.xlu1 %v83_v15  ;;  %81 = vmax.xlane.f32.xlu0 %v80_v16  ;;  %v50_v7 = vld [vmem:[%s1517_s1 + $0x70] sm:$0xff]  ;;  %v52_v8 = vld [vmem:[%s1517_s1 + $0x80] sm:$0xff] }
  0x10   :  { %v54_v11 = vld [vmem:[%s1517_s1 + $0x90] sm:$0xff] }
  0x13   :  { %90 = vmax.xlane.f32.xlu1 %v89_v19  ;;  %87 = vmax.xlane.f32.xlu0 %v86_v20 }
  0x17   :  { %96 = vmax.xlane.f32.xlu1 %v95_v23  ;;  %93 = vmax.xlane.f32.xlu0 %v92_v24 }
  0x1b   :  { %102 = vmax.xlane.f32.xlu1 %v101_v27  ;;  %99 = vmax.xlane.f32.xlu0 %v98_v28 }
  0x1f   :  { %108 = vmax.xlane.f32.xlu1 %v107_v31  ;;  %105 = vmax.xlane.f32.xlu0 %v104_v32 }
  0x23   :  { %114 = vmax.xlane.f32.xlu1 %v113_v35  ;;  %111 = vmax.xlane.f32.xlu0 %v110_v36 }
  0x27   :  { %120 = vmax.xlane.f32.xlu1 %v119_v39  ;;  %117 = vmax.xlane.f32.xlu0 %v116_v40 }
  0x2b   :  { %126 = vmax.xlane.f32.xlu1 %v125_v43  ;;  %123 = vmax.xlane.f32.xlu0 %v122_v44 }
  0x2f   :  { %132 = vmax.xlane.f32.xlu1 %v131_v47  ;;  %129 = vmax.xlane.f32.xlu0 %v128_v48 }
  0x33   :  { %135 = vmax.xlane.f32.xlu0 %v134_v50 }
  0x40   :  { %372 = vperm.xlu1 %747, %v37_v51  }
  0x44   :  { %377 = vperm.xlu1 %747, %v38_v52  }
  0x48   :  { %382 = vperm.xlu1 %747, %v39_v53  }
  0x49   :  { %367 = vperm.xlu0 %746, %v36_v54  }
  0x4c   :  { %387 = vperm.xlu1 %747, %v40_v55  }
  0x4d   :  { %412 = vperm.xlu0 %746, %v45_v56  }
  0x50   :  { %392 = vperm.xlu1 %747, %v41_v57  }
  0x51   :  { %422 = vperm.xlu0 %746, %v47_v58  }
  0x54   :  { %397 = vperm.xlu1 %747, %v42_v59  }
  0x55   :  { %432 = vperm.xlu0 %746, %v49_v60  }
  0x58   :  { %402 = vperm.xlu1 %747, %v43_v61  }
  0x59   :  { %442 = vperm.xlu0 %746, %v51_v62  }
  0x5c   :  { %407 = vperm.xlu1 %747, %v44_v63  }
  0x5d   :  { %452 = vperm.xlu0 %746, %v53_v3  }
  0x60   :  { %417 = vperm.xlu1 %747, %v46_v4  }
  0x64   :  { %427 = vperm.xlu1 %747, %v48_v5  }
  0x68   :  { %437 = vperm.xlu1 %747, %v50_v7  }
  0x6c   :  { %447 = vperm.xlu1 %747, %v52_v8  }
  0x70   :  { %457 = vperm.xlu1 %747, %v54_v11  }
  0x90   :  { %v1096_v12 = vpop.xlane.xlu1 %69  ;;  %v1098_v15 = vpop.xlane.xlu0 %63 }
  0x91   :  { %v139_v16 = vsub.f32 %v867_v0, %v1096_v12  ;;  %v137_v19 = vsub.f32 %v872_v1, %v1098_v15 }
  0x93   :  { %v166_v20 = vmul.f32 1.442695, %v139_v16  ;;  %v162_v23 = vmul.f32 1.442695, %v137_v19 }
  0x94   :  { %v1104_v24 = vpop.xlane.xlu1 %72  ;;  %v1106_v27 = vpop.xlane.xlu0 %66 }
  0x95   :  { %748 = vpow2.f32 %v166_v20  ;;  %v140_v28 = vsub.f32 %v877_v2, %v1104_v24  ;;  %v138_v31 = vsub.f32 %v886_v6, %v1106_v27 }
  0x96   :  { %750 = vpow2.f32 %v162_v23 }
  0x97   :  { %v168_v32 = vmul.f32 1.442695, %v140_v28  ;;  %v164_v35 = vmul.f32 1.442695, %v138_v31 }
  0x98   :  { %v1112_v36 = vpop.xlane.xlu1 %78  ;;  %v1114_v39 = vpop.xlane.xlu0 %75 }
  0x99   :  { %752 = vpow2.f32 %v168_v32  ;;  %v142_v40 = vsub.f32 %v895_v9, %v1112_v36  ;;  %v141_v43 = vsub.f32 %v900_v10, %v1114_v39 }
  0x9a   :  { %754 = vpow2.f32 %v164_v35 }
  0x9b   :  { %v172_v44 = vmul.f32 1.442695, %v142_v40  ;;  %v170_v47 = vmul.f32 1.442695, %v141_v43 }
  0x9c   :  { %v1120_v48 = vpop.xlane.xlu1 %84  ;;  %v1122_v50 = vpop.xlane.xlu0 %81 }
  0x9d   :  { %756 = vpow2.f32 %v172_v44  ;;  %v144_v51 = vsub.f32 %v909_v13, %v1120_v48  ;;  %v143_v52 = vsub.f32 %v914_v14, %v1122_v50 }
  0x9e   :  { %758 = vpow2.f32 %v170_v47 }
  0x9f   :  { %v749_v53 = vpop.eup %748  ;;  %v176_v54 = vmul.f32 1.442695, %v144_v51  ;;  %v174_v55 = vmul.f32 1.442695, %v143_v52 }
  0xa0   :  { %v751_v56 = vpop.eup %750  ;;  %v1128_v57 = vpop.xlane.xlu1 %90  ;;  %v218_v4 = vsel %vm61_vm0, %v749_v53, 0.0 }
  0xa1   :  { %1534 = vst [vmem:[#allocation2_spill] sm:$0xff] %v1128_v57  ;;  %v1130_v58 = vpop.xlane.xlu0 %87  ;;  %760 = vpow2.f32 %v176_v54  ;;  %v146_v59 = vsub.f32 %v923_v17, %v1128_v57  ;;  %v212_v61 = vsel %vm61_vm0, %v751_v56, 0.0 }
  0xa2   :  { %v145_v60 = vsub.f32 %v928_v18, %v1130_v58  ;;  %762 = vpow2.f32 %v174_v55  ;;  %213 = vadd.xlane.f32.xlu1 %v212_v61 }
  0xa3   :  { %v753_v62 = vpop.eup %752  ;;  %v180_v63 = vmul.f32 1.442695, %v146_v59 }
  0xa4   :  { %v178_v3 = vmul.f32 1.442695, %v145_v60  ;;  %v755_v5 = vpop.eup %754  ;;  %v1138_v7 = vpop.xlane.xlu1 %96  ;;  %v221_v31 = vsel %vm61_vm0, %v753_v62, 0.0 }
  0xa5   :  { %1535 = vst [vmem:[#allocation3_spill] sm:$0xff] %v1138_v7  ;;  %v1140_v8 = vpop.xlane.xlu0 %93  ;;  %764 = vpow2.f32 %v180_v63  ;;  %v148_v11 = vsub.f32 %v937_v21, %v1138_v7  ;;  %v215_v19 = vsel %vm61_vm0, %v755_v5, 0.0 }
  0xa6   :  { %v147_v16 = vsub.f32 %v942_v22, %v1140_v8  ;;  %766 = vpow2.f32 %v178_v3  ;;  %219 = vadd.xlane.f32.xlu1 %v218_v4  ;;  %216 = vadd.xlane.f32.xlu0 %v215_v19 }
  0xa7   :  { %v757_v20 = vpop.eup %756  ;;  %v184_v23 = vmul.f32 1.442695, %v148_v11 }
  0xa8   :  { %v182_v28 = vmul.f32 1.442695, %v147_v16  ;;  %v759_v32 = vpop.eup %758  ;;  %v1148_v35 = vpop.xlane.xlu1 %102  ;;  %v227_v54 = vsel %vm61_vm0, %v757_v20, 0.0 }
  0xa9   :  { %1536 = vst [vmem:[#allocation4_spill] sm:$0xff] %v1148_v35  ;;  %v1150_v40 = vpop.xlane.xlu0 %99  ;;  %768 = vpow2.f32 %v184_v23  ;;  %v150_v43 = vsub.f32 %v951_v25, %v1148_v35  ;;  %v224_v47 = vsel %vm61_vm0, %v759_v32, 0.0 }
  0xaa   :  { %1537 = vst [vmem:[#allocation5_spill] sm:$0xff] %v1150_v40  ;;  %v149_v44 = vsub.f32 %v956_v26, %v1150_v40  ;;  %770 = vpow2.f32 %v182_v28  ;;  %222 = vadd.xlane.f32.xlu0 %v221_v31  ;;  %225 = vadd.xlane.f32.xlu1 %v224_v47 }
  0xab   :  { %v761_v51 = vpop.eup %760  ;;  %v188_v52 = vmul.f32 1.442695, %v150_v43 }
  0xac   :  { %v186_v53 = vmul.f32 1.442695, %v149_v44  ;;  %v763_v55 = vpop.eup %762  ;;  %v1158_v56 = vpop.xlane.xlu1 %108  ;;  %v233_v5 = vsel %vm61_vm0, %v761_v51, 0.0 }
  0xad   :  { %1538 = vst [vmem:[#allocation6_spill] sm:$0xff] %v1158_v56  ;;  %v1160_v59 = vpop.xlane.xlu0 %105  ;;  %772 = vpow2.f32 %v188_v52  ;;  %v152_v60 = vsub.f32 %v965_v29, %v1158_v56  ;;  %v230_v62 = vsel %vm61_vm0, %v763_v55, 0.0 }
  0xae   :  { %1539 = vst [vmem:[#allocation7_spill] sm:$0xff] %v1160_v59  ;;  %v151_v61 = vsub.f32 %v970_v30, %v1160_v59  ;;  %774 = vpow2.f32 %v186_v53  ;;  %228 = vadd.xlane.f32.xlu0 %v227_v54  ;;  %231 = vadd.xlane.f32.xlu1 %v230_v62 }
  0xaf   :  { %v765_v63 = vpop.eup %764  ;;  %v192_v3 = vmul.f32 1.442695, %v152_v60 }
  0xb0   :  { %v190_v4 = vmul.f32 1.442695, %v151_v61  ;;  %v767_v11 = vpop.eup %766  ;;  %v1168_v16 = vpop.xlane.xlu1 %114  ;;  %v239_v44 = vsel %vm61_vm0, %v765_v63, 0.0 }
  0xb1   :  { %1540 = vst [vmem:[#allocation8_spill] sm:$0xff] %v1168_v16  ;;  %v1170_v19 = vpop.xlane.xlu0 %111  ;;  %776 = vpow2.f32 %v192_v3  ;;  %v154_v20 = vsub.f32 %v979_v33, %v1168_v16  ;;  %v236_v28 = vsel %vm61_vm0, %v767_v11, 0.0 }
  0xb2   :  { %1541 = vst [vmem:[#allocation9_spill] sm:$0xff] %v1170_v19  ;;  %v153_v23 = vsub.f32 %v984_v34, %v1170_v19  ;;  %778 = vpow2.f32 %v190_v4  ;;  %234 = vadd.xlane.f32.xlu0 %v233_v5  ;;  %237 = vadd.xlane.f32.xlu1 %v236_v28 }
  0xb3   :  { %v769_v31 = vpop.eup %768  ;;  %v196_v32 = vmul.f32 1.442695, %v154_v20 }
  0xb4   :  { %v194_v43 = vmul.f32 1.442695, %v153_v23  ;;  %v771_v47 = vpop.eup %770  ;;  %v1178_v51 = vpop.xlane.xlu1 %120  ;;  %v245_v63 = vsel %vm61_vm0, %v769_v31, 0.0 }
  0xb5   :  { %1542 = vst [vmem:[#allocation10_spill] sm:$0xff] %v1178_v51  ;;  %v1180_v52 = vpop.xlane.xlu0 %117  ;;  %780 = vpow2.f32 %v196_v32  ;;  %v156_v53 = vsub.f32 %v993_v37, %v1178_v51  ;;  %v242_v55 = vsel %vm61_vm0, %v771_v47, 0.0 }
  0xb6   :  { %1543 = vst [vmem:[#allocation11_spill] sm:$0xff] %v1180_v52  ;;  %v155_v54 = vsub.f32 %v998_v38, %v1180_v52  ;;  %782 = vpow2.f32 %v194_v43  ;;  %240 = vadd.xlane.f32.xlu0 %v239_v44  ;;  %243 = vadd.xlane.f32.xlu1 %v242_v55 }
  0xb7   :  { %v773_v60 = vpop.eup %772  ;;  %v200_v61 = vmul.f32 1.442695, %v156_v53 }
  0xb8   :  { %v198_v62 = vmul.f32 1.442695, %v155_v54  ;;  %v775_v3 = vpop.eup %774  ;;  %v1188_v4 = vpop.xlane.xlu1 %126  ;;  %v251_v43 = vsel %vm61_vm0, %v773_v60, 0.0 }
  0xb9   :  { %1544 = vst [vmem:[#allocation12_spill] sm:$0xff] %v1188_v4  ;;  %v1190_v5 = vpop.xlane.xlu0 %123  ;;  %784 = vpow2.f32 %v200_v61  ;;  %v158_v11 = vsub.f32 %v1007_v41, %v1188_v4  ;;  %v248_v23 = vsel %vm61_vm0, %v775_v3, 0.0 }
  0xba   :  { %1545 = vst [vmem:[#allocation13_spill] sm:$0xff] %v1190_v5  ;;  %v157_v20 = vsub.f32 %v1012_v42, %v1190_v5  ;;  %786 = vpow2.f32 %v198_v62  ;;  %246 = vadd.xlane.f32.xlu0 %v245_v63  ;;  %249 = vadd.xlane.f32.xlu1 %v248_v23 }
  0xbb   :  { %v777_v28 = vpop.eup %776  ;;  %v204_v32 = vmul.f32 1.442695, %v158_v11 }
  0xbc   :  { %v202_v31 = vmul.f32 1.442695, %v157_v20  ;;  %v779_v44 = vpop.eup %778  ;;  %v1198_v47 = vpop.xlane.xlu1 %132  ;;  %v257_v3 = vsel %vm61_vm0, %v777_v28, 0.0 }
  0xbd   :  { %1546 = vst [vmem:[#allocation14_spill] sm:$0xff] %v1198_v47  ;;  %v1200_v53 = vpop.xlane.xlu0 %129  ;;  %788 = vpow2.f32 %v204_v32  ;;  %v160_v54 = vsub.f32 %v1021_v45, %v1198_v47  ;;  %v254_v61 = vsel %vm61_vm0, %v779_v44, 0.0 }
  0xbe   :  { %1547 = vst [vmem:[#allocation15_spill] sm:$0xff] %v1200_v53  ;;  %v159_v55 = vsub.f32 %v1026_v46, %v1200_v53  ;;  %790 = vpow2.f32 %v202_v31  ;;  %252 = vadd.xlane.f32.xlu0 %v251_v43  ;;  %255 = vadd.xlane.f32.xlu1 %v254_v61 }
  0xbf   :  { %v781_v62 = vpop.eup %780  ;;  %v208_v63 = vmul.f32 1.442695, %v160_v54 }
  0xc0   :  { %v206_v60 = vmul.f32 1.442695, %v159_v55  ;;  %v783_v11 = vpop.eup %782  ;;  %v263_v44 = vsel %vm61_vm0, %v781_v62, 0.0 }
  0xc1   :  { %v1208_v20 = vpop.xlane.xlu0 %135  ;;  %792 = vpow2.f32 %v208_v63  ;;  %v260_v32 = vsel %vm61_vm0, %v783_v11, 0.0 }
  0xc2   :  { %1548 = vst [vmem:[#allocation16_spill] sm:$0xff] %v1208_v20  ;;  %v161_v23 = vsub.f32 %v1035_v49, %v1208_v20  ;;  %794 = vpow2.f32 %v206_v60  ;;  %258 = vadd.xlane.f32.xlu0 %v257_v3  ;;  %261 = vadd.xlane.f32.xlu1 %v260_v32  ;;  %v373_v32 = vpop.permute.xlu1 %372 }
  0xc3   :  { %v785_v31 = vpop.eup %784 }
  0xc4   :  { %v210_v43 = vmul.f32 1.442695, %v161_v23  ;;  %v787_v54 = vpop.eup %786  ;;  %v269_v61 = vsel %vm61_vm0, %v785_v31, 0.0 }
  0xc5   :  { %v266_v28 = vsel %vm61_vm0, %v787_v54, 0.0 }
  0xc6   :  { %796 = vpow2.f32 %v210_v43  ;;  %264 = vadd.xlane.f32.xlu0 %v263_v44  ;;  %267 = vadd.xlane.f32.xlu1 %v266_v28  ;;  %v378_v31 = vpop.permute.xlu1 %377 }
  0xc7   :  { %v789_v55 = vpop.eup %788 }
  0xc8   :  { %v791_v63 = vpop.eup %790  ;;  %v275_v3 = vsel %vm61_vm0, %v789_v55, 0.0  ;;  %v58_v55 = vld [vmem:[%s1517_s1 + $0xb0] sm:$0xff]  ;;  %v368_v4 = vpop.permute.xlu0 %367 }
  0xc9   :  { %v272_v47 = vsel %vm61_vm0, %v791_v63, 0.0 }
  0xca   :  { %270 = vadd.xlane.f32.xlu0 %v269_v61  ;;  %273 = vadd.xlane.f32.xlu1 %v272_v47  ;;  %v383_v54 = vpop.permute.xlu1 %382  ;;  %v56_v47 = vld [vmem:[%s1517_s1 + $0xa0] sm:$0xff]  ;;  %v55_v61 = vld [vmem:[%s1517_s1 + $0x98] sm:$0xff] }
  0xcb   :  { %v793_v60 = vpop.eup %792 }
  0xcc   :  { %v795_v11 = vpop.eup %794  ;;  %v281_v43 = vsel %vm61_vm0, %v793_v60, 0.0  ;;  %v60_v60 = vld [vmem:[%s1517_s1 + $0xc0] sm:$0xff] }
  0xcd   :  { %v278_v62 = vsel %vm61_vm0, %v795_v11, 0.0  ;;  %v362_v11 = vlaneseq }
  0xce   :  { %276 = vadd.xlane.f32.xlu0 %v275_v3  ;;  %279 = vadd.xlane.f32.xlu1 %v278_v62  ;;  %v388_v28 = vpop.permute.xlu1 %387  ;;  %v57_v3 = vld [vmem:[%s1517_s1 + $0xa8] sm:$0xff] }
  0xd0   :  { %v797_v23 = vpop.eup %796 }
  0xd1   :  { %v284_v44 = vsel %vm61_vm0, %v797_v23, 0.0  ;;  %v59_v23 = vld [vmem:[%s1517_s1 + $0xb8] sm:$0xff] }
  0xd2   :  { %282 = vadd.xlane.f32.xlu0 %v281_v43  ;;  %285 = vadd.xlane.f32.xlu1 %v284_v44  ;;  %v393_v63 = vpop.permute.xlu1 %392  ;;  %v363_v43 = vand.u32 127, %v362_v11 }
  0xd6   :  { %v398_v62 = vpop.permute.xlu1 %397 }
  0xda   :  { %v403_v44 = vpop.permute.xlu1 %402 }
  0xe3   :  { %467 = vperm.xlu1 %747, %v56_v47   ;;  %v1239_v47 = vcvt.s32.f32 %v363_v43 }
  0xe5   :  { %v490_v20 = vsub.f32 %v1239_v47, %v368_v4  ;;  %v493_v11 = vsub.f32 %v1239_v47, %v383_v54  ;;  %v496_v43 = vsub.f32 %v1239_v47, %v398_v62  ;;  %v495_v4 = vsub.f32 %v1239_v47, %v393_v63 }
  0xe7   :  { %477 = vperm.xlu1 %747, %v58_v55   ;;  %v491_v55 = vsub.f32 %v1239_v47, %v373_v32  ;;  %v515_v51 = vand.u32 2147483647, %v490_v20  ;;  %v413_v32 = vpop.permute.xlu0 %412  ;;  %v518_v7 = vand.u32 2147483647, %v493_v11  ;;  %v521_v20 = vand.u32 2147483647, %v496_v43 }
  0xe8   :  { %462 = vperm.xlu0 %746, %v55_v61   ;;  %v408_v61 = vpop.permute.xlu1 %407 }
  0xe9   :  { %v516_v53 = vand.u32 2147483647, %v491_v55  ;;  %v540_v52 = vsub.f32 1.0, %v515_v51  ;;  %v497_v51 = vsub.f32 %v1239_v47, %v403_v44  ;;  %v546_v11 = vsub.f32 1.0, %v521_v20 }
  0xeb   :  { %487 = vperm.xlu1 %747, %v60_v60   ;;  %v492_v60 = vsub.f32 %v1239_v47, %v378_v31  ;;  %v541_v16 = vsub.f32 1.0, %v516_v53  ;;  %v498_v31 = vsub.f32 %v1239_v47, %v408_v61  ;;  %v565_v59 = vmax.f32 %v540_v52, 0.0  ;;  %v423_v57 = vpop.permute.xlu0 %422 }
  0xec   :  { %472 = vperm.xlu0 %746, %v57_v3   ;;  %v494_v3 = vsub.f32 %v1239_v47, %v388_v28  ;;  %v418_v5 = vpop.permute.xlu1 %417  ;;  %v571_v44 = vmax.f32 %v546_v11, 0.0 }
  0xed   :  { %v517_v56 = vand.u32 2147483647, %v492_v60  ;;  %v566_v35 = vmax.f32 %v541_v16, 0.0  ;;  %v543_v60 = vsub.f32 1.0, %v518_v7  ;;  %v523_v62 = vand.u32 2147483647, %v498_v31 }
  0xee   :  { %v590_v63 = vmul.f32 %v565_v59, %v872_v1 }
  0xef   :  { %v542_v19 = vsub.f32 1.0, %v517_v56  ;;  %v591_v54 = vmul.f32 %v566_v35, %v886_v6  ;;  %v500_v56 = vsub.f32 %v1239_v47, %v418_v5  ;;  %v568_v40 = vmax.f32 %v543_v60, 0.0  ;;  %v433_v5 = vpop.permute.xlu0 %432 }
  0xf0   :  { %482 = vperm.xlu0 %746, %v59_v23   ;;  %v519_v23 = vand.u32 2147483647, %v494_v3  ;;  %v428_v55 = vpop.permute.xlu1 %427  ;;  %v520_v3 = vand.u32 2147483647, %v495_v4  ;;  %v522_v6 = vand.u32 2147483647, %v497_v51 }
  0xf1   :  { %v567_v53 = vmax.f32 %v542_v19, 0.0  ;;  %v618_v19 = vsel %vm61_vm0, %v591_v54, 0.0  ;;  %v548_v35 = vsub.f32 1.0, %v523_v62  ;;  %v525_v43 = vand.u32 2147483647, %v500_v56 }
  0xf2   :  { %v544_v28 = vsub.f32 1.0, %v519_v23  ;;  %v499_v23 = vsub.f32 %v1239_v47, %v413_v32  ;;  %v545_v52 = vsub.f32 1.0, %v520_v3  ;;  %v502_v4 = vsub.f32 %v1239_v47, %v428_v55 }
  0xf3   :  { %v592_v7 = vmul.f32 %v567_v53, %v867_v0  ;;  %v615_v31 = vsel %vm61_vm0, %v590_v63, 0.0  ;;  %v501_v32 = vsub.f32 %v1239_v47, %v423_v57  ;;  %v593_v0 = vmul.f32 %v568_v40, %v877_v2  ;;  %v443_v11 = vpop.permute.xlu0 %442 }
  0xf4   :  { %v569_v16 = vmax.f32 %v544_v28, 0.0  ;;  %v438_v61 = vpop.permute.xlu1 %437  ;;  %v524_v59 = vand.u32 2147483647, %v499_v23  ;;  %v570_v20 = vmax.f32 %v545_v52, 0.0  ;;  %v547_v53 = vsub.f32 1.0, %v522_v6 }
  0xf5   :  { %v621_v28 = vsel %vm61_vm0, %v592_v7, 0.0  ;;  %v573_v60 = vmax.f32 %v548_v35, 0.0  ;;  %v550_v54 = vsub.f32 1.0, %v525_v43  ;;  %v527_v55 = vand.u32 2147483647, %v502_v4 }
  0xf6   :  { %v594_v1 = vmul.f32 %v569_v16, %v900_v10  ;;  %v504_v51 = vsub.f32 %v1239_v47, %v438_v61  ;;  %v596_v10 = vmul.f32 %v571_v44, %v914_v14  ;;  %v549_v56 = vsub.f32 1.0, %v524_v59 }
  0xf7   :  { %v526_v57 = vand.u32 2147483647, %v501_v32  ;;  %v503_v16 = vsub.f32 %v1239_v47, %v433_v5  ;;  %v624_v2 = vsel %vm61_vm0, %v593_v0, 0.0  ;;  %v572_v40 = vmax.f32 %v547_v53, 0.0  ;;  %v453_v0 = vpop.permute.xlu0 %452 }
  0xf8   :  { %v448_v3 = vpop.permute.xlu1 %447  ;;  %v627_v62 = vsel %vm61_vm0, %v594_v1, 0.0  ;;  %v575_v63 = vmax.f32 %v550_v54, 0.0  ;;  %v598_v23 = vmul.f32 %v573_v60, %v928_v18  ;;  %v552_v61 = vsub.f32 1.0, %v527_v55 }
  0xf9   :  { %v529_v7 = vand.u32 2147483647, %v504_v51  ;;  %v506_v52 = vsub.f32 %v1239_v47, %v448_v3  ;;  %v633_v14 = vsel %vm61_vm0, %v596_v10, 0.0  ;;  %v574_v35 = vmax.f32 %v549_v56, 0.0 }
  0xfa   :  { %v551_v43 = vsub.f32 1.0, %v526_v57  ;;  %v528_v44 = vand.u32 2147483647, %v503_v16  ;;  %v505_v4 = vsub.f32 %v1239_v47, %v443_v11  ;;  %v639_v5 = vsel %vm61_vm0, %v598_v23, 0.0 }
  0xfb   :  { %v577_v1 = vmax.f32 %v552_v61, 0.0  ;;  %v554_v59 = vsub.f32 1.0, %v529_v7  ;;  %v531_v32 = vand.u32 2147483647, %v506_v52  ;;  %v599_v60 = vmul.f32 %v574_v35, %v923_v17 }
  0xfc   :  { %v458_v6 = vpop.permute.xlu1 %457  ;;  %v553_v53 = vsub.f32 1.0, %v528_v44  ;;  %v530_v54 = vand.u32 2147483647, %v505_v4  ;;  %v507_v3 = vsub.f32 %v1239_v47, %v453_v0 }
  0xfd   :  { %v556_v51 = vsub.f32 1.0, %v531_v32  ;;  %v602_v10 = vmul.f32 %v577_v1, %v956_v26  ;;  %v642_v56 = vsel %vm61_vm0, %v599_v60, 0.0 }
  0xfe   :  { %v578_v57 = vmax.f32 %v553_v53, 0.0  ;;  %v555_v16 = vsub.f32 1.0, %v530_v54  ;;  %v532_v11 = vand.u32 2147483647, %v507_v3 }
 0x100   :  { %v603_v61 = vmul.f32 %v578_v57, %v951_v25  ;;  %v557_v52 = vsub.f32 1.0, %v532_v11 }
 0x102   :  { %v582_v35 = vmax.f32 %v557_v52, 0.0 }
 0x10f   :  { %619 = vadd.xlane.f32.xlu1 %v618_v19  ;;  %616 = vadd.xlane.f32.xlu0 %v615_v31  ;;  %v595_v19 = vmul.f32 %v570_v20, %v895_v9  ;;  %v600_v9 = vmul.f32 %v575_v63, %v942_v22  ;;  %v597_v31 = vmul.f32 %v572_v40, %v909_v13  ;;  %v576_v20 = vmax.f32 %v551_v43, 0.0 }
 0x110   :  { %v579_v13 = vmax.f32 %v554_v59, 0.0  ;;  %v651_v63 = vsel %vm61_vm0, %v602_v10, 0.0 }
 0x111   :  { %v630_v18 = vsel %vm61_vm0, %v595_v19, 0.0  ;;  %v645_v55 = vsel %vm61_vm0, %v600_v9, 0.0  ;;  %v636_v22 = vsel %vm61_vm0, %v597_v31, 0.0  ;;  %v601_v17 = vmul.f32 %v576_v20, %v937_v21 }
 0x112   :  { %v604_v23 = vmul.f32 %v579_v13, %v970_v30  ;;  %v580_v19 = vmax.f32 %v555_v16, 0.0  ;;  %v654_v21 = vsel %vm61_vm0, %v603_v61, 0.0 }
 0x113   :  { %628 = vadd.xlane.f32.xlu1 %v627_v62  ;;  %622 = vadd.xlane.f32.xlu0 %v621_v28  ;;  %v508_v28 = vsub.f32 %v1239_v47, %v458_v6  ;;  %v648_v26 = vsel %vm61_vm0, %v601_v17, 0.0 }
 0x114   :  { %v605_v44 = vmul.f32 %v580_v19, %v965_v29 }
 0x115   :  { %v533_v62 = vand.u32 2147483647, %v508_v28 }
 0x116   :  { %v660_v4 = vsel %vm61_vm0, %v605_v44, 0.0 }
 0x117   :  { %634 = vadd.xlane.f32.xlu1 %v633_v14  ;;  %625 = vadd.xlane.f32.xlu0 %v624_v2  ;;  %v581_v2 = vmax.f32 %v556_v51, 0.0  ;;  %v558_v40 = vsub.f32 1.0, %v533_v62  ;;  %v657_v14 = vsel %vm61_vm0, %v604_v23, 0.0 }
 0x119   :  { %v583_v7 = vmax.f32 %v558_v40, 0.0  ;;  %v606_v6 = vmul.f32 %v581_v2, %v984_v34 }
 0x11b   :  { %640 = vadd.xlane.f32.xlu1 %v639_v5  ;;  %631 = vadd.xlane.f32.xlu0 %v630_v18  ;;  %v663_v30 = vsel %vm61_vm0, %v606_v6, 0.0  ;;  %v608_v43 = vmul.f32 %v583_v7, %v998_v38  ;;  %v607_v5 = vmul.f32 %v582_v35, %v979_v33 }
 0x11d   :  { %v669_v25 = vsel %vm61_vm0, %v608_v43, 0.0  ;;  %v666_v18 = vsel %vm61_vm0, %v607_v5, 0.0 }
 0x11f   :  { %646 = vadd.xlane.f32.xlu1 %v645_v55  ;;  %637 = vadd.xlane.f32.xlu0 %v636_v22 }
 0x123   :  { %652 = vadd.xlane.f32.xlu1 %v651_v63  ;;  %643 = vadd.xlane.f32.xlu0 %v642_v56 }
 0x127   :  { %658 = vadd.xlane.f32.xlu1 %v657_v14  ;;  %649 = vadd.xlane.f32.xlu0 %v648_v26 }
 0x12b   :  { %664 = vadd.xlane.f32.xlu1 %v663_v30  ;;  %655 = vadd.xlane.f32.xlu0 %v654_v21 }
 0x12f   :  { %v1297_v34 = vpop.xlane.xlu1 %213  ;;  %670 = vadd.xlane.f32.xlu1 %v669_v25  ;;  %661 = vadd.xlane.f32.xlu0 %v660_v4 }
 0x130   :  { %798 = vlog2.f32 %v1297_v34 }
 0x133   :  { %v1300_v9 = vpop.xlane.xlu1 %219  ;;  %667 = vadd.xlane.f32.xlu0 %v666_v18  ;;  %v1302_v38 = vpop.xlane.xlu0 %216 }
 0x134   :  { %800 = vlog2.f32 %v1302_v38 }
 0x135   :  { %802 = vlog2.f32 %v1300_v9 }
 0x137   :  { %v1304_v29 = vpop.xlane.xlu1 %225  ;;  %v1306_v31 = vpop.xlane.xlu0 %222 }
 0x138   :  { %804 = vlog2.f32 %v1304_v29 }
 0x139   :  { %806 = vlog2.f32 %v1306_v31 }
 0x13b   :  { %v1308_v1 = vpop.xlane.xlu1 %231  ;;  %v1310_v59 = vpop.xlane.xlu0 %228 }
 0x13c   :  { %808 = vlog2.f32 %v1308_v1 }
 0x13d   :  { %810 = vlog2.f32 %v1310_v59 }
 0x13f   :  { %v1312_v33 = vpop.xlane.xlu1 %237  ;;  %v1314_v32 = vpop.xlane.xlu0 %234 }
 0x140   :  { %812 = vlog2.f32 %v1312_v33 }
 0x141   :  { %814 = vlog2.f32 %v1314_v32 }
 0x143   :  { %v1316_v28 = vpop.xlane.xlu1 %243  ;;  %v1318_v0 = vpop.xlane.xlu0 %240 }
 0x144   :  { %816 = vlog2.f32 %v1316_v28 }
 0x145   :  { %818 = vlog2.f32 %v1318_v0 }
 0x147   :  { %v1320_v20 = vpop.xlane.xlu1 %249  ;;  %v1322_v53 = vpop.xlane.xlu0 %246 }
 0x148   :  { %820 = vlog2.f32 %v1320_v20 }
 0x149   :  { %822 = vlog2.f32 %v1322_v53 }
 0x14b   :  { %v1324_v60 = vpop.xlane.xlu1 %255  ;;  %v1326_v54 = vpop.xlane.xlu0 %252 }
 0x14c   :  { %824 = vlog2.f32 %v1324_v60 }
 0x14d   :  { %826 = vlog2.f32 %v1326_v54 }
 0x14f   :  { %v1328_v3 = vpop.xlane.xlu1 %261  ;;  %v1330_v55 = vpop.xlane.xlu0 %258 }
 0x150   :  { %828 = vlog2.f32 %v1328_v3 }
 0x153   :  { %v1332_v22 = vpop.xlane.xlu1 %267  ;;  %v1334_v13 = vpop.xlane.xlu0 %264 }
 0x157   :  { %v1336_v51 = vpop.xlane.xlu1 %273  ;;  %v1338_v62 = vpop.xlane.xlu0 %270 }
 0x15b   :  { %v1340_v10 = vpop.xlane.xlu1 %279  ;;  %v1342_v56 = vpop.xlane.xlu0 %276 }
 0x15f   :  { %v1344_v57 = vpop.xlane.xlu1 %285  ;;  %v1346_v16 = vpop.xlane.xlu0 %282 }
 0x163   :  { %v468_v11 = vpop.permute.xlu1 %467 }
 0x164   :  { %v510_v17 = vsub.f32 %v1239_v47, %v468_v11 }
 0x166   :  { %v535_v2 = vand.u32 2147483647, %v510_v17 }
 0x167   :  { %v478_v40 = vpop.permute.xlu1 %477  ;;  %v463_v63 = vpop.permute.xlu0 %462 }
 0x168   :  { %v560_v23 = vsub.f32 1.0, %v535_v2  ;;  %v512_v19 = vsub.f32 %v1239_v47, %v478_v40  ;;  %v509_v26 = vsub.f32 %v1239_v47, %v463_v63 }
 0x16a   :  { %v585_v61 = vmax.f32 %v560_v23, 0.0  ;;  %v537_v7 = vand.u32 2147483647, %v512_v19  ;;  %v534_v52 = vand.u32 2147483647, %v509_v26 }
 0x16b   :  { %v488_v14 = vpop.permute.xlu1 %487  ;;  %v473_v6 = vpop.permute.xlu0 %472 }
 0x16c   :  { %v562_v21 = vsub.f32 1.0, %v537_v7  ;;  %v559_v35 = vsub.f32 1.0, %v534_v52  ;;  %v514_v30 = vsub.f32 %v1239_v47, %v488_v14  ;;  %v511_v43 = vsub.f32 %v1239_v47, %v473_v6 }
 0x16d   :  { %v610_v44 = vmul.f32 %v585_v61, %v1012_v42 }
 0x16e   :  { %v587_v25 = vmax.f32 %v562_v21, 0.0  ;;  %v584_v4 = vmax.f32 %v559_v35, 0.0  ;;  %v539_v5 = vand.u32 2147483647, %v514_v30  ;;  %v536_v18 = vand.u32 2147483647, %v511_v43 }
 0x16f   :  { %v675_v11 = vsel %vm61_vm0, %v610_v44, 0.0  ;;  %v483_v17 = vpop.permute.xlu0 %482 }
 0x170   :  { %v564_v2 = vsub.f32 1.0, %v539_v5  ;;  %676 = vadd.xlane.f32.xlu1 %v675_v11  ;;  %v513_v40 = vsub.f32 %v1239_v47, %v483_v17  ;;  %v612_v63 = vmul.f32 %v587_v25, %v1026_v46  ;;  %v609_v23 = vmul.f32 %v584_v4, %v993_v37 }
 0x171   :  { %v561_v19 = vsub.f32 1.0, %v536_v18 }
 0x172   :  { %v589_v26 = vmax.f32 %v564_v2, 0.0  ;;  %v538_v7 = vand.u32 2147483647, %v513_v40  ;;  %v681_v42 = vsel %vm61_vm0, %v612_v63, 0.0  ;;  %v672_v61 = vsel %vm61_vm0, %v609_v23, 0.0 }
 0x173   :  { %v586_v52 = vmax.f32 %v561_v19, 0.0  ;;  %673 = vadd.xlane.f32.xlu0 %v672_v61 }
 0x174   :  { %v563_v14 = vsub.f32 1.0, %v538_v7  ;;  %682 = vadd.xlane.f32.xlu1 %v681_v42  ;;  %v614_v6 = vmul.f32 %v589_v26, %v1035_v49 }
 0x175   :  { %v611_v21 = vmul.f32 %v586_v52, %v1007_v41  ;;  %v799_v41 = vpop.eup %798  ;;  %830 = vlog2.f32 %v1330_v55 }
 0x176   :  { %v588_v47 = vmax.f32 %v563_v14, 0.0  ;;  %v687_v46 = vsel %vm61_vm0, %v614_v6, 0.0  ;;  %v801_v49 = vpop.eup %800  ;;  %v288_v43 = vmul.f32 0.6931472, %v799_v41  ;;  %832 = vlog2.f32 %v1332_v22 }
 0x177   :  { %v678_v37 = vsel %vm61_vm0, %v611_v21, 0.0  ;;  %v290_v44 = vmul.f32 0.6931472, %v801_v49 }
 0x178   :  { %688 = vadd.xlane.f32.xlu1 %v687_v46  ;;  %679 = vadd.xlane.f32.xlu0 %v678_v37  ;;  %v613_v35 = vmul.f32 %v588_v47, %v1021_v45  ;;  %v803_v45 = vpop.eup %802  ;;  %v337_v1 = vadd.f32 %v288_v43, %v1098_v15  ;;  %834 = vlog2.f32 %v1334_v13 }
 0x179   :  { %v805_v34 = vpop.eup %804  ;;  %v292_v38 = vmul.f32 0.6931472, %v803_v45  ;;  %v338_v31 = vadd.f32 %v290_v44, %v1106_v27  ;;  %v1550_v44 = vld [vmem:[#allocation2_spill] sm:$0xff]  ;;  %836 = vlog2.f32 %v1336_v51 }
 0x17a   :  { %v684_v30 = vsel %vm61_vm0, %v613_v35, 0.0  ;;  %v807_v9 = vpop.eup %806  ;;  %v296_v29 = vmul.f32 0.6931472, %v805_v34  ;;  %838 = vlog2.f32 %v1338_v62 }
 0x17b   :  { %v809_v25 = vpop.eup %808  ;;  %v294_v18 = vmul.f32 0.6931472, %v807_v9  ;;  %v339_v27 = vadd.f32 %v292_v38, %v1096_v12  ;;  %840 = vlog2.f32 %v1340_v10 }
 0x17c   :  { %685 = vadd.xlane.f32.xlu0 %v684_v30  ;;  %v811_v32 = vpop.eup %810  ;;  %v300_v28 = vmul.f32 0.6931472, %v809_v25  ;;  %v341_v15 = vadd.f32 %v296_v29, %v1114_v39  ;;  %842 = vlog2.f32 %v1342_v56 }
 0x17d   :  { %v813_v0 = vpop.eup %812  ;;  %v298_v63 = vmul.f32 0.6931472, %v811_v32  ;;  %v340_v39 = vadd.f32 %v294_v18, %v1104_v24  ;;  %844 = vlog2.f32 %v1344_v57  ;;  %v1560_v57 = vld [vmem:[#allocation15_spill] sm:$0xff] }
 0x17e   :  { %v815_v40 = vpop.eup %814  ;;  %v304_v23 = vmul.f32 0.6931472, %v813_v0  ;;  %v343_v12 = vadd.f32 %v300_v28, %v1122_v50  ;;  %846 = vlog2.f32 %v1346_v16 }
 0x17f   :  { %v817_v53 = vpop.eup %816  ;;  %v302_v61 = vmul.f32 0.6931472, %v815_v40  ;;  %v342_v50 = vadd.f32 %v298_v63, %v1112_v36  ;;  %v1554_v40 = vld [vmem:[#allocation4_spill] sm:$0xff] }
 0x180   :  { %v819_v42 = vpop.eup %818  ;;  %v308_v52 = vmul.f32 0.6931472, %v817_v53  ;;  %v345_v24 = vadd.f32 %v304_v23, %v1130_v58 }
 0x181   :  { %v821_v54 = vpop.eup %820  ;;  %v306_v46 = vmul.f32 0.6931472, %v819_v42  ;;  %v344_v58 = vadd.f32 %v302_v61, %v1120_v48  ;;  %v1549_v48 = vld [vmem:[#allocation5_spill] sm:$0xff]  ;;  %v1556_v42 = vld [vmem:[#allocation6_spill] sm:$0xff] }
 0x182   :  { %v823_v47 = vpop.eup %822  ;;  %v312_v37 = vmul.f32 0.6931472, %v821_v54  ;;  %v347_v36 = vadd.f32 %v308_v52, %v1140_v8 }
 0x183   :  { %v825_v55 = vpop.eup %824  ;;  %v310_v45 = vmul.f32 0.6931472, %v823_v47  ;;  %v346_v34 = vadd.f32 %v306_v46, %v1550_v44 }
 0x184   :  { %v827_v49 = vpop.eup %826  ;;  %v316_v43 = vmul.f32 0.6931472, %v825_v55  ;;  %v349_v8 = vadd.f32 %v312_v37, %v1549_v48 }
 0x185   :  { %v829_v9 = vpop.eup %828  ;;  %v314_v25 = vmul.f32 0.6931472, %v827_v49  ;;  %v1559_v49 = vld [vmem:[#allocation10_spill] sm:$0xff] }
 0x187   :  { %v350_v63 = vadd.f32 %v314_v25, %v1554_v40 }
 0x19c   :  { %v620_v59 = vpop.xlane.xlu1 %619  ;;  %v617_v4 = vpop.xlane.xlu0 %616 }
 0x19d   :  { %v691_v33 = vsub.f32 %v338_v31, %v620_v59  ;;  %v690_v5 = vsub.f32 %v337_v1, %v617_v4  ;;  %v831_v1 = vpop.eup %830  ;;  %v320_v59 = vmul.f32 0.6931472, %v829_v9  ;;  %v1551_v4 = vld [vmem:[#allocation7_spill] sm:$0xff] }
 0x19e   :  { %v833_v18 = vpop.eup %832 }
 0x19f   :  { %717 = vst.msk [vmem:[%s1518_s2 + $0x8] sm:$0xff] %vm715_vm1, %v691_v33  ;;  %716 = vst.msk [vmem:[%s1518_s2] sm:$0xff] %vm715_vm1, %v690_v5  ;;  %v351_v33 = vadd.f32 %v316_v43, %v1551_v4  ;;  %v1552_v5 = vld [vmem:[#allocation3_spill] sm:$0xff]  ;;  %v835_v23 = vpop.eup %834 }
 0x1a0   :  { %v629_v11 = vpop.xlane.xlu1 %628  ;;  %v623_v20 = vpop.xlane.xlu0 %622  ;;  %v348_v32 = vadd.f32 %v310_v45, %v1552_v5 }
 0x1a1   :  { %v694_v17 = vsub.f32 %v341_v15, %v629_v11  ;;  %v692_v2 = vsub.f32 %v339_v27, %v623_v20  ;;  %v318_v11 = vmul.f32 0.6931472, %v831_v1  ;;  %v324_v20 = vmul.f32 0.6931472, %v833_v18  ;;  %v837_v47 = vpop.eup %836 }
 0x1a2   :  { %v839_v46 = vpop.eup %838  ;;  %v328_v37 = vmul.f32 0.6931472, %v837_v47 }
 0x1a3   :  { %720 = vst.msk [vmem:[%s1518_s2 + $0x20] sm:$0xff] %vm715_vm1, %v694_v17  ;;  %718 = vst.msk [vmem:[%s1518_s2 + $0x10] sm:$0xff] %vm715_vm1, %v692_v2  ;;  %v1553_v17 = vld [vmem:[#allocation9_spill] sm:$0xff]  ;;  %v352_v61 = vadd.f32 %v318_v11, %v1556_v42 }
 0x1a4   :  { %v635_v19 = vpop.xlane.xlu1 %634  ;;  %v626_v60 = vpop.xlane.xlu0 %625  ;;  %v353_v2 = vadd.f32 %v320_v59, %v1553_v17 }
 0x1a5   :  { %v696_v26 = vsub.f32 %v343_v12, %v635_v19  ;;  %v693_v7 = vsub.f32 %v340_v39, %v626_v60  ;;  %v322_v60 = vmul.f32 0.6931472, %v835_v23 }
 0x1a7   :  { %722 = vst.msk [vmem:[%s1518_s2 + $0x30] sm:$0xff] %vm715_vm1, %v696_v26  ;;  %719 = vst.msk [vmem:[%s1518_s2 + $0x18] sm:$0xff] %vm715_vm1, %v693_v7  ;;  %v1555_v26 = vld [vmem:[#allocation11_spill] sm:$0xff] }
 0x1a8   :  { %v641_v14 = vpop.xlane.xlu1 %640  ;;  %v632_v3 = vpop.xlane.xlu0 %631  ;;  %v355_v7 = vadd.f32 %v324_v20, %v1555_v26 }
 0x1a9   :  { %v698_v6 = vsub.f32 %v345_v24, %v641_v14  ;;  %v695_v21 = vsub.f32 %v342_v50, %v632_v3  ;;  %v1557_v14 = vld [vmem:[#allocation8_spill] sm:$0xff] }
 0x1aa   :  { %v354_v3 = vadd.f32 %v322_v60, %v1557_v14 }
 0x1ab   :  { %724 = vst.msk [vmem:[%s1518_s2 + $0x40] sm:$0xff] %vm715_vm1, %v698_v6  ;;  %721 = vst.msk [vmem:[%s1518_s2 + $0x28] sm:$0xff] %vm715_vm1, %v695_v21 }
 0x1ac   :  { %v647_v35 = vpop.xlane.xlu1 %646  ;;  %v638_v22 = vpop.xlane.xlu0 %637 }
 0x1ad   :  { %v700_v30 = vsub.f32 %v347_v36, %v647_v35  ;;  %v697_v41 = vsub.f32 %v344_v58, %v638_v22  ;;  %v841_v36 = vpop.eup %840  ;;  %v326_v58 = vmul.f32 0.6931472, %v839_v46  ;;  %v1558_v22 = vld [vmem:[#allocation13_spill] sm:$0xff] }
 0x1ae   :  { %v843_v55 = vpop.eup %842  ;;  %v332_v35 = vmul.f32 0.6931472, %v841_v36 }
 0x1af   :  { %726 = vst.msk [vmem:[%s1518_s2 + $0x50] sm:$0xff] %vm715_vm1, %v700_v30  ;;  %723 = vst.msk [vmem:[%s1518_s2 + $0x38] sm:$0xff] %vm715_vm1, %v697_v41  ;;  %v357_v30 = vadd.f32 %v328_v37, %v1558_v22  ;;  %v845_v51 = vpop.eup %844  ;;  %v356_v10 = vadd.f32 %v326_v58, %v1559_v49  ;;  %v330_v45 = vmul.f32 0.6931472, %v843_v55 }
 0x1b0   :  { %v653_v38 = vpop.xlane.xlu1 %652  ;;  %v644_v13 = vpop.xlane.xlu0 %643  ;;  %v336_v56 = vmul.f32 0.6931472, %v845_v51  ;;  %v359_v16 = vadd.f32 %v332_v35, %v1560_v57 }
 0x1b1   :  { %v702_v29 = vsub.f32 %v349_v8, %v653_v38  ;;  %v699_v31 = vsub.f32 %v346_v34, %v644_v13  ;;  %v847_v48 = vpop.eup %846  ;;  %v1561_v38 = vld [vmem:[#allocation16_spill] sm:$0xff] }
 0x1b2   :  { %v334_v9 = vmul.f32 0.6931472, %v847_v48  ;;  %v361_v13 = vadd.f32 %v336_v56, %v1561_v38 }
 0x1b3   :  { %728 = vst.msk [vmem:[%s1518_s2 + $0x60] sm:$0xff] %vm715_vm1, %v702_v29  ;;  %725 = vst.msk [vmem:[%s1518_s2 + $0x48] sm:$0xff] %vm715_vm1, %v699_v31  ;;  %v1562_v29 = vld [vmem:[#allocation12_spill] sm:$0xff] }
 0x1b4   :  { %v659_v28 = vpop.xlane.xlu1 %658  ;;  %v650_v15 = vpop.xlane.xlu0 %649  ;;  %v358_v31 = vadd.f32 %v330_v45, %v1562_v29 }
 0x1b5   :  { %v704_v27 = vsub.f32 %v351_v33, %v659_v28  ;;  %v701_v0 = vsub.f32 %v348_v32, %v650_v15  ;;  %v1563_v33 = vld [vmem:[#allocation14_spill] sm:$0xff] }
 0x1b6   :  { %v360_v5 = vadd.f32 %v334_v9, %v1563_v33 }
 0x1b7   :  { %730 = vst.msk [vmem:[%s1518_s2 + $0x70] sm:$0xff] %vm715_vm1, %v704_v27  ;;  %727 = vst.msk [vmem:[%s1518_s2 + $0x58] sm:$0xff] %vm715_vm1, %v701_v0 }
 0x1b8   :  { %v665_v12 = vpop.xlane.xlu1 %664  ;;  %v656_v39 = vpop.xlane.xlu0 %655 }
 0x1b9   :  { %v706_v53 = vsub.f32 %v353_v2, %v665_v12  ;;  %v703_v19 = vsub.f32 %v350_v63, %v656_v39 }
 0x1bb   :  { %732 = vst.msk [vmem:[%s1518_s2 + $0x80] sm:$0xff] %vm715_vm1, %v706_v53  ;;  %729 = vst.msk [vmem:[%s1518_s2 + $0x68] sm:$0xff] %vm715_vm1, %v703_v19 }
 0x1bc   :  { %v671_v52 = vpop.xlane.xlu1 %670  ;;  %v662_v24 = vpop.xlane.xlu0 %661 }
 0x1bd   :  { %v708_v50 = vsub.f32 %v355_v7, %v671_v52  ;;  %v705_v54 = vsub.f32 %v352_v61, %v662_v24 }
 0x1bf   :  { %734 = vst.msk [vmem:[%s1518_s2 + $0x90] sm:$0xff] %vm715_vm1, %v708_v50  ;;  %731 = vst.msk [vmem:[%s1518_s2 + $0x78] sm:$0xff] %vm715_vm1, %v705_v54 }
 0x1c0   :  { %v668_v6 = vpop.xlane.xlu0 %667 }
 0x1c1   :  { %v707_v21 = vsub.f32 %v354_v3, %v668_v6 }
 0x1c3   :  { %733 = vst.msk [vmem:[%s1518_s2 + $0x88] sm:$0xff] %vm715_vm1, %v707_v21 }
 0x1fd   :  { %v677_v41 = vpop.xlane.xlu1 %676 }
 0x1fe   :  { %v710_v62 = vsub.f32 %v357_v30, %v677_v41 }
 0x200   :  { %736 = vst.msk [vmem:[%s1518_s2 + $0xa0] sm:$0xff] %vm715_vm1, %v710_v62  ;;  %v674_v43 = vpop.xlane.xlu0 %673 }
 0x201   :  { %v683_v8 = vpop.xlane.xlu1 %682  ;;  %v709_v44 = vsub.f32 %v356_v10, %v674_v43 }
 0x202   :  { %v712_v34 = vsub.f32 %v359_v16, %v683_v8 }
 0x203   :  { %735 = vst.msk [vmem:[%s1518_s2 + $0x98] sm:$0xff] %vm715_vm1, %v709_v44 }
 0x204   :  { %738 = vst.msk [vmem:[%s1518_s2 + $0xb0] sm:$0xff] %vm715_vm1, %v712_v34 }
 0x205   :  { %v689_v1 = vpop.xlane.xlu1 %688  ;;  %v680_v25 = vpop.xlane.xlu0 %679 }
 0x206   :  { %v714_v59 = vsub.f32 %v361_v13, %v689_v1  ;;  %v711_v4 = vsub.f32 %v358_v31, %v680_v25 }
 0x208   :  { %740 = vst.msk [vmem:[%s1518_s2 + $0xc0] sm:$0xff] %vm715_vm1, %v714_v59  ;;  %737 = vst.msk [vmem:[%s1518_s2 + $0xa8] sm:$0xff] %vm715_vm1, %v711_v4 }
 0x209   :  { %v686_v32 = vpop.xlane.xlu0 %685 }
 0x20a   :  { %v713_v18 = vsub.f32 %v360_v5, %v686_v32 }
 0x20c   :  { %739 = vst.msk [vmem:[%s1518_s2 + $0xb8] sm:$0xff] %vm715_vm1, %v713_v18 }

</bundles_post_ra>
